<compile_context>
chip_gen: v7x
topology: tpu7x:2x2x1
jax: 0.10.0
libtpu: 0.0.40
codegen_flags: <defaults>
</compile_context>

<pallas_src>
import functools

import jax
import jax.numpy as jnp
from jax.experimental import pallas as pl
from jax.experimental.pallas import tpu as pltpu


# ----------------------------- in-kernel helpers -----------------------------

def _softmax_last(s):
    """Numerically-stable softmax over the last (lane) axis.

    Denominator reciprocal on the EUP (approx=True) + one Newton step on the VPU:
    essentially free and ~f32 accurate.
    """
    m = jnp.max(s, axis=-1, keepdims=True)
    p = jnp.exp(s - m)
    denom = jnp.sum(p, axis=-1, keepdims=True)
    r = pl.reciprocal(denom, approx=True)
    r = r * (2.0 - denom * r)            # one NR step
    return p * r


# --------------------------------- kernels -----------------------------------
# Block shapes per grid step (batch tile of TB rows on the middle enc axis):
#   hid_ref / hproj_ref : (TB, H)
#   enc_ref             : (S, TB, H)   <- native (S, B, H) layout, no HBM transpose
#   out_ref             : (TB, S)

def _dot_kernel(hid_ref, enc_ref, out_ref):
    h = hid_ref[...]                                      # (TB, H)
    e = enc_ref[...]                                      # (S, TB, H)
    scores_sb = jnp.sum(e * h[None, :, :], axis=-1)       # (S, TB) — VPU mul + lane reduce
    scores = jnp.transpose(scores_sb)                     # (TB, S) — small XLU transpose
    out_ref[...] = _softmax_last(scores)


def _concat_kernel(hproj_ref, enc_ref, wet_ref, v_ref, out_ref):
    # hproj = hidden @ Wh^T + b is hoisted to the wrapper (computed once for all rows).
    s, tb, hdim = enc_ref.shape
    e2 = enc_ref[...].reshape(s * tb, hdim)
    eproj = jnp.dot(e2, wet_ref[...], preferred_element_type=jnp.float32)     # MXU
    energy = jnp.tanh(eproj.reshape(s, tb, hdim) + hproj_ref[...][None, :, :])
    scores_sb = jnp.sum(energy * v_ref[...][None, :, :], axis=-1)             # (S, TB)
    out_ref[...] = _softmax_last(jnp.transpose(scores_sb))


# ------------------------------ tile selection --------------------------------

def _pick_tb(B, S, H, *, enc_like_bufs, extra_bytes=0, budget_bytes=12 << 20):
    """Largest batch tile whose per-step working set fits a conservative VMEM budget.

    enc_like_bufs counts enc-block-sized buffers held per step (double buffer +
    in-kernel intermediates). Clamped so the grid has ~8 steps when B allows
    (pipelining + v7x megacore), and kept a multiple of 8 (or == B) for layout.
    """
    per_row = enc_like_bufs * S * H * 4 + 2 * H * 4 + 2 * S * 4
    tb = max(1, (budget_bytes - extra_bytes) // per_row)
    tb = min(tb, max(8, -(-B // 8)))      # aim for >= ~8 grid steps
    if tb >= B:
        return B
    tb = max(8, (tb // 8) * 8)            # sublane-aligned second-minor dim
    return min(tb, B)


# --------------------------------- wrapper ------------------------------------

@functools.partial(jax.jit, static_argnums=0)
def attn_forward(method, hidden, encoder_outputs, params):
    """Pallas implementation of Attn.forward.

    hidden:          (1, B, H) float32
    encoder_outputs: (S, B, H) float32
    returns:         (B, 1, S) float32 — attention weights (softmax over S)
    """
    S, B, H = encoder_outputs.shape
    hid = hidden[0]                                       # (B, H), free view

    cparams = pltpu.CompilerParams(
        dimension_semantics=("parallel",),
        vmem_limit_bytes=32 << 20,
    )

    def call(kernel, hid_like, extra_args, extra_specs, enc_like_bufs, extra_bytes):
        TB = _pick_tb(B, S, H, enc_like_bufs=enc_like_bufs, extra_bytes=extra_bytes)
        grid = (pl.cdiv(B, TB),)
        hid_spec = pl.BlockSpec((TB, H), lambda i: (i, 0))
        enc_spec = pl.BlockSpec((S, TB, H), lambda i: (0, i, 0))   # batch on middle axis
        out_spec = pl.BlockSpec((TB, S), lambda i: (i, 0))
        return pl.pallas_call(
            kernel,
            out_shape=jax.ShapeDtypeStruct((B, S), jnp.float32),
            grid=grid,
            in_specs=[hid_spec, enc_spec] + list(extra_specs),
            out_specs=out_spec,
            compiler_params=cparams,
        )(hid_like, encoder_outputs, *extra_args)

    if method == "dot":
        out = call(_dot_kernel, hid, (), (), enc_like_bufs=4, extra_bytes=0)

    elif method == "general":
        # scores = enc . (hid @ W) + hid.b ; the hid.b term is constant per batch row
        # and cancels exactly in the softmax, so only the folded hidden is needed.
        hW = hid @ params["W"]                            # (B, H) — one tiny XLA matmul
        out = call(_dot_kernel, hW, (), (), enc_like_bufs=4, extra_bytes=0)

    elif method == "concat":
        W = params["W"]                                   # (H, 2H): [:, :H] hits hidden, [:, H:] hits enc
        b = params["b"]
        v = params["v"].reshape(1, H)
        hproj = hid @ W[:, :H].T + b                      # (B, H) — hoisted, one XLA matmul
        Wet = W[:, H:].T                                  # (H, H), pre-transposed for the kernel
        w_spec = pl.BlockSpec((H, H), lambda i: (0, 0))
        row_spec = pl.BlockSpec((1, H), lambda i: (0, 0))
        out = call(_concat_kernel, hproj, (Wet, v), (w_spec, row_spec),
                   enc_like_bufs=6, extra_bytes=2 * H * H * 4)

    else:
        raise ValueError(method, "is not an appropriate attention method.")

    return out[:, None, :]                                # (B, 1, S)


# ---------------------------- pure-JAX reference -------------------------------

def attn_reference(method, hidden, encoder_outputs, params):
    S, B, H = encoder_outputs.shape
    if method == "dot":
        energies = jnp.sum(hidden * encoder_outputs, axis=2)                 # (S, B)
    elif method == "general":
        energy = encoder_outputs @ params["W"].T + params["b"]
        energies = jnp.sum(hidden * energy, axis=2)
    elif method == "concat":
        hid_exp = jnp.broadcast_to(hidden, (S, B, H))
        cat = jnp.concatenate([hid_exp, encoder_outputs], axis=2)            # (S, B, 2H)
        energy = jnp.tanh(cat @ params["W"].T + params["b"])
        energies = jnp.sum(params["v"] * energy, axis=2)
    energies = energies.T                                                    # (B, S)
    return jax.nn.softmax(energies, axis=1)[:, None, :]                      # (B, 1, S)


# ------------------------------------ main -------------------------------------

if __name__ == "__main__":
    B, S, H = 2, 8, 32
    key = jax.random.PRNGKey(0)
    k_hid, k_enc, kw_g, kb_g, kw_c, kb_c, kv_c = jax.random.split(key, 7)

    hidden = jax.random.normal(k_hid, (1, B, H), dtype=jnp.float32)
    encoder_outputs = jax.random.normal(k_enc, (S, B, H), dtype=jnp.float32)

    # Deterministic synthetic parameters (shapes per the module __init__).
    params_by_method = {
        "dot": {},
        "general": {
            "W": 0.1 * jax.random.normal(kw_g, (H, H), dtype=jnp.float32),
            "b": 0.1 * jax.random.normal(kb_g, (H,), dtype=jnp.float32),
        },
        "concat": {
            "W": 0.1 * jax.random.normal(kw_c, (H, 2 * H), dtype=jnp.float32),
            "b": 0.1 * jax.random.normal(kb_c, (H,), dtype=jnp.float32),
            "v": jax.random.normal(kv_c, (H,), dtype=jnp.float32),
        },
    }

    ok = True
    for method in ("dot", "general", "concat"):
        params = params_by_method[method]
        out = jax.block_until_ready(attn_forward(method, hidden, encoder_outputs, params))
        ref = attn_reference(method, hidden, encoder_outputs, params)
        if out.shape != (B, 1, S):
            ok = False
        if not jnp.allclose(out, ref, atol=2e-5, rtol=2e-5):
            ok = False

    if ok:
        print("KERNEL_OK")
</pallas_src>

<mosaic_0001>
module attributes {stable_mosaic.version = 11 : i64} {
  func.func @_dot_kernel(%arg0: i32, %arg1: memref<2x32xf32, #tpu.memory_space<vmem>>, %arg2: memref<8x2x32xf32, #tpu.memory_space<vmem>>, %arg3: memref<2x8xf32, #tpu.memory_space<vmem>>) attributes {dimension_semantics = [#tpu.dimension_semantics<parallel>], iteration_bounds = array<i64: 1>, scalar_prefetch = 0 : i64, scratch_operands = 0 : i64, tpu.core_type = #tpu.core_type<tc>, window_params = [{transform_indices = @transform_0, window_bounds = array<i64: 2, 32>}, {transform_indices = @transform_1, window_bounds = array<i64: 8, 2, 32>}, {transform_indices = @transform_2, window_bounds = array<i64: 2, 8>}]} {
    %c0 = arith.constant 0 : index
    %c0_0 = arith.constant 0 : index
    %0 = vector.load %arg1[%c0, %c0_0] : memref<2x32xf32, #tpu.memory_space<vmem>>, vector<2x32xf32>
    %c0_1 = arith.constant 0 : index
    %c0_2 = arith.constant 0 : index
    %c0_3 = arith.constant 0 : index
    %1 = vector.load %arg2[%c0_1, %c0_2, %c0_3] : memref<8x2x32xf32, #tpu.memory_space<vmem>>, vector<8x2x32xf32>
    %2 = vector.shape_cast %0 : vector<2x32xf32> to vector<1x2x32xf32>
    %3 = vector.broadcast %2 : vector<1x2x32xf32> to vector<8x2x32xf32>
    %4 = arith.mulf %1, %3 : vector<8x2x32xf32>
    %cst = arith.constant dense<0.000000e+00> : vector<8x2xf32>
    %5 = vector.multi_reduction <add>, %4, %cst [2] : vector<8x2x32xf32> to vector<8x2xf32>
    %6 = tpu.transpose %5, [1, 0] : vector<8x2xf32> -> vector<2x8xf32>
    %cst_4 = arith.constant dense<0xFF800000> : vector<2xf32>
    %7 = vector.multi_reduction <maximumf>, %6, %cst_4 [1] : vector<2x8xf32> to vector<2xf32>
    %8 = vector.shape_cast %7 : vector<2xf32> to vector<2x1xf32>
    %9 = vector.broadcast %8 : vector<2x1xf32> to vector<2x8xf32>
    %10 = arith.subf %6, %9 : vector<2x8xf32>
    %11 = math.exp %10 : vector<2x8xf32>
    %cst_5 = arith.constant dense<0.000000e+00> : vector<2xf32>
    %12 = vector.multi_reduction <add>, %11, %cst_5 [1] : vector<2x8xf32> to vector<2xf32>
    %13 = vector.shape_cast %12 : vector<2xf32> to vector<2x1xf32>
    %14 = tpu.reciprocal %13 {approx = true} : vector<2x1xf32> -> vector<2x1xf32>
    %15 = arith.mulf %13, %14 : vector<2x1xf32>
    %cst_6 = arith.constant 2.000000e+00 : f32
    %16 = vector.broadcast %cst_6 : f32 to vector<2x1xf32>
    %17 = arith.subf %16, %15 : vector<2x1xf32>
    %18 = arith.mulf %14, %17 : vector<2x1xf32>
    %19 = vector.broadcast %18 : vector<2x1xf32> to vector<2x8xf32>
    %20 = arith.mulf %11, %19 : vector<2x8xf32>
    %c0_7 = arith.constant 0 : index
    %c0_8 = arith.constant 0 : index
    %21 = vector.load %arg3[%c0_7, %c0_8] : memref<2x8xf32, #tpu.memory_space<vmem>>, vector<2x8xf32>
    tpu.vector_store %arg3[%c0_7, %c0_8], %20 {strides = array<i32>} : memref<2x8xf32, #tpu.memory_space<vmem>>, vector<2x8xf32>,
    return
  }
  func.func @transform_0(%arg0: i32) -> (i32, i32) {
    %c0_i32 = arith.constant 0 : i32
    %c0_i32_0 = arith.constant 0 : i32
    return %arg0, %c0_i32 : i32, i32
  }
  func.func @transform_1(%arg0: i32) -> (i32, i32, i32) {
    %c0_i32 = arith.constant 0 : i32
    %c0_i32_0 = arith.constant 0 : i32
    %c0_i32_1 = arith.constant 0 : i32
    return %c0_i32, %arg0, %c0_i32_0 : i32, i32, i32
  }
  func.func @transform_2(%arg0: i32) -> (i32, i32) {
    %c0_i32 = arith.constant 0 : i32
    %c0_i32_0 = arith.constant 0 : i32
    return %arg0, %c0_i32 : i32, i32
  }
}

</mosaic_0001>

<bundles_post_ra>
// kernel: attn_forward.1
= control target key start
LH: loop header
LB: loop body
LE: loop exit
PB: predicated region body
PF: predicated region fallthrough
CT: control target
= control target key end

     0   :  { %7 = vsyncpa [#allocation3], 0  ;;  %s302_s0 = inlined_call_operand.vmem [shape: f32[2,32], index: 0, kind: input, shape index: {}]   ;;  %s303_s1 = inlined_call_operand.hbm [shape: f32[8,2,32], index: 1, kind: input, shape index: {}]   ;;  %s304_s2 = inlined_call_operand.hbm [shape: f32[2,8], index: 2, kind: output, shape index: {}]  }
   0x1   :  { %8 = vsyncpa [#allocation4], 0  ;;  %s245_s9 = smov [#allocation2]   ;;  %s197_s13 = scalar_lea.hbm %s303_s1, 256 }
   0x2   :  { %s16_s10 = sshll.u32 %s245_s9, 4  ;;  %p198_p0 = scmp.ne.s32.totalorder %s303_s1, %s197_s13  ;;  %s17_s10 = int_to_ptr.vmem [resolvable:$true] %s16_s10 }
   0x3   :  { %p201_p1 = scmp.lt.u32.totalorder %s197_s13, %s303_s1 }
   0x5   :  { %p203_p2 = pnand %p201_p1, %p198_p0 }
   0x7   :  { %206 = shalt.err (!%p203_p2)
}
   0x8   :  { %s207_s18 = scalar_lea.vmem %s17_s10, 256  ;;  %p212_p4 = scmp.lt.s32.totalorder %s17_s10, %s17_s10 }
   0x9   :  { %p208_p3 = scmp.ne.s32.totalorder %s17_s10, %s207_s18  ;;  %p213_p5 = scmp.lt.s32.totalorder %s207_s18, %s207_s18 }
   0xb   :  { %p214_p6 = por %p213_p5, %p212_p4 }
   0xd   :  { %p215_p7 = pnand %p214_p6, %p208_p3 }
   0xf   :  { %218 = shalt.err (!%p215_p7)
}
  0x10   :  { %s246_s19 = smov 32   ;;  %s247_s20 = smov 2  }
  0x11   :  { %22 = dma.hbm_to_vmem [thread:$0]  %s303_s1, 256, %s17_s10, [#allocation3], %s246_s19, %s246_s19, %s247_s20  }
  0x12   :  { %241 = dma.done.wait [#allocation3], 256  }
  0x13   :  { %242 = vsyncadd [#allocation3], 4294967040  ;;  %vm43_vm0 = vcmask 254976   ;;  %v26_v0 = vld [vmem:[%s302_s0] sm:$0x3]  ;;  %v76_v25 = vlaneseq  ;;  %vm110_vm1 = vcmask 1041409  }
  0x14   :  { %v27_v1 = vld [vmem:[#allocation2] sm:$0x3]  ;;  %v29_v2 = vld [vmem:[#allocation2 + $0x4] sm:$0x3]  ;;  %v28_v5 = vld [vmem:[#allocation2 + $0x2] sm:$0x3] }
  0x15   :  { %v35_v3 = vmul.f32 %v27_v1, %v26_v0  ;;  %v37_v4 = vmul.f32 %v29_v2, %v26_v0  ;;  %v30_v6 = vld [vmem:[#allocation2 + $0x6] sm:$0x3]  ;;  %v36_v7 = vmul.f32 %v28_v5, %v26_v0  ;;  %v31_v9 = vld [vmem:[#allocation2 + $0x8] sm:$0x3]  ;;  %v32_v10 = vld [vmem:[#allocation2 + $0xa] sm:$0x3] }
  0x16   :  { %v38_v8 = vmul.f32 %v30_v6, %v26_v0  ;;  %v39_v15 = vmul.f32 %v31_v9, %v26_v0  ;;  %v40_v16 = vmul.f32 %v32_v10, %v26_v0  ;;  %v33_v17 = vld [vmem:[#allocation2 + $0xc] sm:$0x3]  ;;  %v34_v18 = vld [vmem:[#allocation2 + $0xe] sm:$0x3]  ;;  %v77_v26 = vand.u32 127, %v76_v25  ;;  %s248_s0 = smov [#allocation5]  }
  0x17   :  { %v44_v11 = vsel %vm43_vm0, %v35_v3, 0.0  ;;  %v50_v12 = vsel %vm43_vm0, %v37_v4, 0.0  ;;  %v47_v13 = vsel %vm43_vm0, %v36_v7, 0.0  ;;  %v41_v21 = vmul.f32 %v33_v17, %v26_v0  ;;  %s179_s1 = sshll.u32 %s248_s0, 4  ;;  %s180_s1 = int_to_ptr.vmem [resolvable:$true] %s179_s1 }
  0x18   :  { %45 = vadd.xlane.f32.xlu0 %v44_v11  ;;  %51 = vadd.xlane.f32.xlu1 %v50_v12  ;;  %v53_v14 = vsel %vm43_vm0, %v38_v8, 0.0  ;;  %v56_v19 = vsel %vm43_vm0, %v39_v15, 0.0  ;;  %v59_v20 = vsel %vm43_vm0, %v40_v16, 0.0  ;;  %v42_v22 = vmul.f32 %v34_v18, %v26_v0  ;;  %s219_s25 = scalar_lea.vmem %s180_s1, 32  ;;  %p224_p9 = scmp.lt.s32.totalorder %s180_s1, %s180_s1 }
  0x19   :  { %v62_v23 = vsel %vm43_vm0, %v41_v21, 0.0  ;;  %v79_v27 = vshrl.u32 %v76_v25, 7  ;;  %vm112_vm2 = vcmask 1042434   ;;  %vm114_vm3 = vcmask 1043459   ;;  %p220_p8 = scmp.ne.s32.totalorder %s180_s1, %s219_s25  ;;  %p225_p10 = scmp.lt.s32.totalorder %s219_s25, %s219_s25 }
  0x1a   :  { %v65_v24 = vsel %vm43_vm0, %v42_v22, 0.0  ;;  %vm116_vm4 = vcmask 1044484   ;;  %vm118_vm5 = vcmask 1045509   ;;  %vm120_vm6 = vcmask 1046534  }
  0x1b   :  { %v80_v30 = vsub.s32 %v77_v26, %v79_v27  ;;  %vm122_vm7 = vcmask 1047559   ;;  %vm157_vm8 = vcmask 58368   ;;  %p226_p11 = por %p225_p10, %p224_p9 }
  0x1c   :  { %48 = vadd.xlane.f32.xlu0 %v47_v13  ;;  %54 = vadd.xlane.f32.xlu1 %v53_v14 }
  0x1d   :  { %p227_p12 = pnand %p226_p11, %p220_p8 }
  0x20   :  { %57 = vadd.xlane.f32.xlu0 %v56_v19  ;;  %60 = vadd.xlane.f32.xlu1 %v59_v20 }
  0x24   :  { %63 = vadd.xlane.f32.xlu0 %v62_v23  ;;  %66 = vadd.xlane.f32.xlu1 %v65_v24 }
  0xa5   :  { %v46_v28 = vpop.xlane.xlu0 %45  ;;  %v52_v29 = vpop.xlane.xlu1 %51 }
  0xa6   :  { %v81_v33 = vrot.slane %v46_v28, %v80_v30  ;;  %v89_v36 = vrot.slane %v52_v29, %v80_v30 }
  0xa9   :  { %v49_v31 = vpop.xlane.xlu0 %48  ;;  %v55_v32 = vpop.xlane.xlu1 %54 }
  0xaa   :  { %v85_v34 = vrot.slane %v49_v31, %v80_v30  ;;  %v93_v35 = vrot.slane %v55_v32, %v80_v30 }
  0xac   :  { %v111_v37 = vsel %vm110_vm1, %v85_v34, %v81_v33 }
  0xad   :  { %v113_v38 = vsel %vm112_vm2, %v89_v36, %v111_v37  ;;  %v58_v39 = vpop.xlane.xlu0 %57  ;;  %v61_v40 = vpop.xlane.xlu1 %60 }
  0xae   :  { %v115_v41 = vsel %vm114_vm3, %v93_v35, %v113_v38  ;;  %v97_v42 = vrot.slane %v58_v39, %v80_v30  ;;  %v101_v43 = vrot.slane %v61_v40, %v80_v30 }
  0xb0   :  { %v117_v44 = vsel %vm116_vm4, %v97_v42, %v115_v41 }
  0xb1   :  { %v64_v45 = vpop.xlane.xlu0 %63  ;;  %v67_v46 = vpop.xlane.xlu1 %66  ;;  %v119_v49 = vsel %vm118_vm5, %v101_v43, %v117_v44 }
  0xb2   :  { %v105_v47 = vrot.slane %v64_v45, %v80_v30  ;;  %v109_v48 = vrot.slane %v67_v46, %v80_v30 }
  0xb4   :  { %v121_v50 = vsel %vm120_vm6, %v105_v47, %v119_v49 }
  0xb5   :  { %v123_v51 = vsel %vm122_vm7, %v109_v48, %v121_v50 }
  0xb6   :  { %125 = vxpose.xlu0.b32.start.end [1/1] (short) (narrow) %v123_v51, 8 }
 0x136   :  { %v141_v52 = vpop.trf.xlu0 }
 0x137   :  { %v158_v53 = vsel %vm157_vm8, %v141_v52, -inf }
 0x138   :  { %159 = vmax.xlane.f32.xlu1 %v158_v53 }
 0x1c5   :  { %v160_v54 = vpop.xlane.xlu1 %159 }
 0x1c6   :  { %v161_v55 = vsub.f32 %v141_v52, %v160_v54 }
 0x1c8   :  { %v162_v56 = vmul.f32 1.442695, %v161_v55 }
 0x1ca   :  { %193 = vpow2.f32 %v162_v56 }
 0x1d4   :  { %v194_v57 = vpop.eup %193 }
 0x1d5   :  { %v164_v58 = vsel %vm157_vm8, %v194_v57, 0.0 }
 0x1d6   :  { %165 = vadd.xlane.f32.xlu1 %v164_v58 }
 0x263   :  { %v166_v59 = vpop.xlane.xlu1 %165 }
 0x264   :  { %195 = vrcp.f32 %v166_v59 }
 0x26e   :  { %v196_v60 = vpop.eup %195 }
 0x26f   :  { %v168_v61 = vmul.f32 %v196_v60, %v166_v59 }
 0x271   :  { %v169_v62 = vsub.f32 2.0, %v168_v61 }
 0x273   :  { %v170_v63 = vmul.f32 %v196_v60, %v169_v62 }
 0x275   :  { %v171_v0 = vmul.f32 %v194_v57, %v170_v63 }
 0x277   :  { %172 = vst.msk [vmem:[#allocation5] sm:$0x3] %vm157_vm8, %v171_v0 }
 0x278   :  { %230 = shalt.err (!%p227_p12)
}
 0x279   :  { %s231_s28 = scalar_lea.hbm %s304_s2, 32 }
 0x27a   :  { %p232_p13 = scmp.ne.s32.totalorder %s304_s2, %s231_s28  ;;  %p235_p0 = scmp.lt.u32.totalorder %s231_s28, %s304_s2 }
 0x27c   :  { %p237_p1 = pnand %p235_p0, %p232_p13 }
 0x27e   :  { %240 = shalt.err (!%p237_p1)
}
 0x27f   :  { %182 = dma.vmem_to_hbm [thread:$0]  %s180_s1, 32, %s304_s2, [#allocation4]  }
 0x280   :  { %243 = dma.done.wait [#allocation4], 32  }
 0x281   :  { %244 = vsyncadd [#allocation4], 4294967264 }
 0x282   :  { %186 = vsyncpa [#allocation3], 1 }
 0x283   :  { %187 = vsyncpa [#allocation4], 1 }

</bundles_post_ra>
